<compile_context>
chip_gen: v7x
topology: tpu7x:2x2x1
jax: 0.10.0
libtpu: 0.0.40
codegen_flags: <defaults>
</compile_context>

<pallas_src>
import functools

import jax
import jax.numpy as jnp
from jax.experimental import pallas as pl
from jax.experimental.pallas import tpu as pltpu


# --------------------------------------------------------------------------- #
# Kernel body
# --------------------------------------------------------------------------- #
def _swish_kernel(x_ref, o_ref, *, compute_dtype):
    x = x_ref[...].astype(compute_dtype)
    # sigmoid(x) = 0.5 * (1 + tanh(x / 2)): one EUP transcendental, exact.
    sig = 0.5 * (1.0 + jnp.tanh(x * 0.5))
    o_ref[...] = (x * sig).astype(o_ref.dtype)


# --------------------------------------------------------------------------- #
# Per-generation configuration
# --------------------------------------------------------------------------- #
def _tpu_generation() -> int:
    try:
        kind = jax.devices()[0].device_kind.lower()
    except Exception:
        return 0
    for gen in (7, 6, 5, 4):
        if f"v{gen}" in kind:
            return gen
    return 0


def _config_for_generation(gen: int) -> dict:
    if gen >= 7:
        # v7x: 64 MiB physical VMEM per TC, 2 TCs, ~3.2 TB/s per TC.
        return dict(target_block_bytes=8 << 20,
                    vmem_limit_bytes=40 << 20,
                    min_parallel_steps=4)
    if gen in (4, 5, 6):
        # 128 MiB physical VMEM, single TensorCore.
        return dict(target_block_bytes=8 << 20,
                    vmem_limit_bytes=64 << 20,
                    min_parallel_steps=2)
    # Unknown backend: conservative defaults.
    return dict(target_block_bytes=4 << 20,
                vmem_limit_bytes=32 << 20,
                min_parallel_steps=2)


def _sublane_multiple(dtype) -> int:
    return {4: 8, 2: 16, 1: 32}.get(jnp.dtype(dtype).itemsize, 8)


# --------------------------------------------------------------------------- #
# Lane-dense 2D fast path (n % 128 == 0)
# --------------------------------------------------------------------------- #
def _swish_2d(x2d, dtype, compute_dtype, cfg):
    rows, width = x2d.shape
    itemsize = jnp.dtype(dtype).itemsize
    sublane = _sublane_multiple(dtype)

    rows_per_block = max(1, cfg["target_block_bytes"] // (width * itemsize))
    tr = min(rows_per_block, rows)
    if rows >= sublane:
        tr = max(sublane, (tr // sublane) * sublane)
        # Megacore / pipelining: keep >= min_parallel_steps grid steps when
        # there is enough data (>= 1 MiB total and >= one sublane tile/step).
        min_steps = cfg["min_parallel_steps"]
        total_bytes = rows * width * itemsize
        if (pl.cdiv(rows, tr) < min_steps
                and rows >= min_steps * sublane
                and total_bytes >= (1 << 20)):
            per_step = pl.cdiv(rows, min_steps)
            tr = max(sublane, (per_step // sublane) * sublane)
    else:
        tr = rows  # tiny input: single full-extent block (always legal)

    grid = (pl.cdiv(rows, tr),)  # ragged last block is masked by Pallas
    kern = functools.partial(_swish_kernel, compute_dtype=compute_dtype)
    n_elems = rows * width

    return pl.pallas_call(
        kern,
        out_shape=jax.ShapeDtypeStruct((rows, width), dtype),
        grid_spec=pltpu.PrefetchScalarGridSpec(
            num_scalar_prefetch=0,
            grid=grid,
            in_specs=[pl.BlockSpec((tr, width), lambda i: (i, 0))],
            out_specs=pl.BlockSpec((tr, width), lambda i: (i, 0)),
        ),
        compiler_params=pltpu.CompilerParams(
            dimension_semantics=("parallel",),
            vmem_limit_bytes=cfg["vmem_limit_bytes"],
        ),
        cost_estimate=pl.CostEstimate(
            flops=4 * n_elems,
            transcendentals=n_elems,
            bytes_accessed=2 * n_elems * itemsize,
        ),
    )(x2d)


# --------------------------------------------------------------------------- #
# Flat 1D fallback for ragged sizes (no pad, no slice: masked last block)
# --------------------------------------------------------------------------- #
def _swish_1d(flat, dtype, compute_dtype, cfg):
    n = flat.shape[0]
    itemsize = jnp.dtype(dtype).itemsize

    # Blocks are multiples of 8192 elements (covers every dtype's min tile);
    # the ragged last block is masked by Pallas on writeback.
    block_elems = max(8192, ((cfg["target_block_bytes"] // itemsize) // 8192) * 8192)
    if block_elems >= n:
        block = n          # single full-extent block (legal for any n)
    else:
        block = block_elems
    grid = (pl.cdiv(n, block),)

    kern = functools.partial(_swish_kernel, compute_dtype=compute_dtype)
    return pl.pallas_call(
        kern,
        out_shape=jax.ShapeDtypeStruct((n,), dtype),
        grid_spec=pltpu.PrefetchScalarGridSpec(
            num_scalar_prefetch=0,
            grid=grid,
            in_specs=[pl.BlockSpec((block,), lambda i: (i,))],
            out_specs=pl.BlockSpec((block,), lambda i: (i,)),
        ),
        compiler_params=pltpu.CompilerParams(
            dimension_semantics=("parallel",),
            vmem_limit_bytes=cfg["vmem_limit_bytes"],
        ),
        cost_estimate=pl.CostEstimate(
            flops=4 * n,
            transcendentals=n,
            bytes_accessed=2 * n * itemsize,
        ),
    )(flat)


# --------------------------------------------------------------------------- #
# Public wrapper: matches torch `x * torch.sigmoid(x)` semantics
# --------------------------------------------------------------------------- #
def swish(x: jnp.ndarray) -> jnp.ndarray:
    orig_shape = x.shape
    orig_dtype = x.dtype
    n = x.size
    if n == 0:
        return x

    gen = _tpu_generation()
    cfg = _config_for_generation(gen)

    # bf16 EUP/VPU exist on v6e/v7x -> compute in bf16 there; f32 otherwise.
    if orig_dtype == jnp.bfloat16 and gen >= 6:
        compute_dtype = jnp.bfloat16
    else:
        compute_dtype = jnp.float32

    # Fast path: widest lane-multiple width dividing n -> free reshape to a
    # lane-dense 2D slab (no pad, no copy).
    width = None
    for w in (4096, 2048, 1024, 512, 256, 128):
        if n % w == 0:
            width = w
            break

    if width is not None:
        out = _swish_2d(x.reshape(-1, width), orig_dtype, compute_dtype, cfg)
    else:
        out = _swish_1d(x.reshape(-1), orig_dtype, compute_dtype, cfg)
    return out.reshape(orig_shape)


if __name__ == "__main__":
    key = jax.random.PRNGKey(0)
    x = jax.random.normal(key, (2, 4, 16, 16), dtype=jnp.float32)  # NCHW

    y = swish(x)
    jax.block_until_ready(y)

    # Reference check in plain JAX (exact sigmoid formulation in the kernel).
    y_ref = x * jax.nn.sigmoid(x)
    assert y.shape == x.shape and y.dtype == x.dtype
    assert jnp.allclose(y, y_ref, atol=1e-4, rtol=1e-4)

    print("KERNEL_OK")
</pallas_src>

<mosaic_0001>
module attributes {stable_mosaic.version = 11 : i64} {
  func.func @_swish_kernel(%arg0: i32, %arg1: memref<1x2048xf32, #tpu.memory_space<vmem>>, %arg2: memref<1x2048xf32, #tpu.memory_space<vmem>>) attributes {dimension_semantics = [#tpu.dimension_semantics<parallel>], iteration_bounds = array<i64: 1>, scalar_prefetch = 0 : i64, scratch_operands = 0 : i64, tpu.core_type = #tpu.core_type<tc>, window_params = [{transform_indices = @transform_0, window_bounds = array<i64: 1, 2048>}, {transform_indices = @transform_1, window_bounds = array<i64: 1, 2048>}]} {
    %c0 = arith.constant 0 : index
    %c0_0 = arith.constant 0 : index
    %0 = vector.load %arg1[%c0, %c0_0] : memref<1x2048xf32, #tpu.memory_space<vmem>>, vector<1x2048xf32>
    %cst = arith.constant 5.000000e-01 : f32
    %1 = vector.broadcast %cst : f32 to vector<1x2048xf32>
    %2 = arith.mulf %0, %1 : vector<1x2048xf32>
    %3 = math.tanh %2 : vector<1x2048xf32>
    %cst_1 = arith.constant 1.000000e+00 : f32
    %4 = vector.broadcast %cst_1 : f32 to vector<1x2048xf32>
    %5 = arith.addf %4, %3 : vector<1x2048xf32>
    %cst_2 = arith.constant 5.000000e-01 : f32
    %6 = vector.broadcast %cst_2 : f32 to vector<1x2048xf32>
    %7 = arith.mulf %6, %5 : vector<1x2048xf32>
    %8 = arith.mulf %0, %7 : vector<1x2048xf32>
    %c0_3 = arith.constant 0 : index
    %c0_4 = arith.constant 0 : index
    %9 = vector.load %arg2[%c0_3, %c0_4] : memref<1x2048xf32, #tpu.memory_space<vmem>>, vector<1x2048xf32>
    tpu.vector_store %arg2[%c0_3, %c0_4], %8 {strides = array<i32>} : memref<1x2048xf32, #tpu.memory_space<vmem>>, vector<1x2048xf32>,
    return
  }
  func.func @transform_0(%arg0: i32) -> (i32, i32) {
    %c0_i32 = arith.constant 0 : i32
    %c0_i32_0 = arith.constant 0 : i32
    return %arg0, %c0_i32 : i32, i32
  }
  func.func @transform_1(%arg0: i32) -> (i32, i32) {
    %c0_i32 = arith.constant 0 : i32
    %c0_i32_0 = arith.constant 0 : i32
    return %arg0, %c0_i32 : i32, i32
  }
}

</mosaic_0001>

<bundles_post_ra>
// kernel: tpu_custom_call.1
= control target key start
LH: loop header
LB: loop body
LE: loop exit
PB: predicated region body
PF: predicated region fallthrough
CT: control target
= control target key end

     0   :  { %6 = vsyncpa [#allocation3], 0  ;;  %s140_s0 = inlined_call_operand.hbm [shape: f32[1,2048], index: 0, kind: input, shape index: {}]   ;;  %s141_s1 = inlined_call_operand.hbm [shape: f32[1,2048], index: 1, kind: output, shape index: {}]  }
   0x1   :  { %7 = vsyncpa [#allocation4], 0  ;;  %s104_s6 = smov [#allocation2]   ;;  %s56_s10 = scalar_lea.hbm %s140_s0, 256 }
   0x2   :  { %s14_s7 = sshll.u32 %s104_s6, 4  ;;  %p57_p0 = scmp.ne.s32.totalorder %s140_s0, %s56_s10  ;;  %s15_s7 = int_to_ptr.vmem [resolvable:$true] %s14_s7 }
   0x3   :  { %p60_p1 = scmp.lt.u32.totalorder %s56_s10, %s140_s0 }
   0x5   :  { %p62_p2 = pnand %p60_p1, %p57_p0 }
   0x7   :  { %65 = shalt.err (!%p62_p2)
}
   0x8   :  { %s66_s15 = scalar_lea.vmem %s15_s7, 256  ;;  %p71_p4 = scmp.lt.s32.totalorder %s15_s7, %s15_s7 }
   0x9   :  { %p67_p3 = scmp.ne.s32.totalorder %s15_s7, %s66_s15  ;;  %p72_p5 = scmp.lt.s32.totalorder %s66_s15, %s66_s15 }
   0xb   :  { %p73_p6 = por %p72_p5, %p71_p4 }
   0xd   :  { %p74_p7 = pnand %p73_p6, %p67_p3 }
   0xf   :  { %77 = shalt.err (!%p74_p7)
}
  0x10   :  { %17 = dma.hbm_to_vmem [thread:$0]  %s140_s0, 256, %s15_s7, [#allocation3]  }
  0x11   :  { %100 = dma.done.wait [#allocation3], 256  }
  0x12   :  { %101 = vsyncadd [#allocation3], 4294967040  ;;  %v21_v0 = vld [vmem:[#allocation2] sm:$0xff]  ;;  %v22_v1 = vld [vmem:[#allocation2 + $0x8] sm:$0xff]  ;;  %s105_s18 = smov [#allocation5]  }
  0x13   :  { %v23_v2 = vmul.f32 0.5, %v21_v0  ;;  %v24_v3 = vmul.f32 0.5, %v22_v1  ;;  %s41_s19 = sshll.u32 %s105_s18, 4  ;;  %s42_s19 = int_to_ptr.vmem [resolvable:$true] %s41_s19 }
  0x14   :  { %s78_s0 = scalar_lea.vmem %s42_s19, 256  ;;  %p83_p9 = scmp.lt.s32.totalorder %s42_s19, %s42_s19 }
  0x15   :  { %52 = vtanh.f32 %v23_v2  ;;  %p79_p8 = scmp.ne.s32.totalorder %s42_s19, %s78_s0  ;;  %p84_p10 = scmp.lt.s32.totalorder %s78_s0, %s78_s0 }
  0x16   :  { %54 = vtanh.f32 %v24_v3 }
  0x17   :  { %p85_p11 = por %p84_p10, %p83_p9 }
  0x19   :  { %p86_p12 = pnand %p85_p11, %p79_p8 }
  0x1f   :  { %v53_v4 = vpop.eup %52 }
  0x20   :  { %v55_v5 = vpop.eup %54  ;;  %v27_v6 = vadd.f32 1.0, %v53_v4 }
  0x21   :  { %v28_v7 = vadd.f32 1.0, %v55_v5 }
  0x22   :  { %v29_v8 = vmul.f32 0.5, %v27_v6 }
  0x23   :  { %v30_v9 = vmul.f32 0.5, %v28_v7 }
  0x24   :  { %v31_v10 = vmul.f32 %v29_v8, %v21_v0 }
  0x25   :  { %v32_v11 = vmul.f32 %v30_v9, %v22_v1 }
  0x26   :  { %33 = vst [vmem:[#allocation5] sm:$0xff] %v31_v10 }
  0x27   :  { %34 = vst [vmem:[#allocation5 + $0x8] sm:$0xff] %v32_v11 }
  0x28   :  { %89 = shalt.err (!%p86_p12)
}
  0x29   :  { %s90_s22 = scalar_lea.hbm %s141_s1, 256 }
  0x2a   :  { %p91_p13 = scmp.ne.s32.totalorder %s141_s1, %s90_s22  ;;  %p94_p0 = scmp.lt.u32.totalorder %s90_s22, %s141_s1 }
  0x2c   :  { %p96_p1 = pnand %p94_p0, %p91_p13 }
  0x2e   :  { %99 = shalt.err (!%p96_p1)
}
  0x2f   :  { %44 = dma.vmem_to_hbm [thread:$0]  %s42_s19, 256, %s141_s1, [#allocation4]  }
  0x30   :  { %102 = dma.done.wait [#allocation4], 256  }
  0x31   :  { %103 = vsyncadd [#allocation4], 4294967040 }
  0x32   :  { %48 = vsyncpa [#allocation3], 1 }
  0x33   :  { %49 = vsyncpa [#allocation4], 1 }

</bundles_post_ra>
